<compile_context>
chip_gen: v5e
topology: v5e:2x2
jax: 0.10.0
libtpu: 0.0.40
codegen_flags: <defaults>
</compile_context>

<pallas_src>
import functools

import jax
import jax.numpy as jnp
from jax.experimental import pallas as pl
from jax.experimental.pallas import tpu as pltpu


_SUPPORTED_ACTS = ("relu", "tanh", "sigmoid", "softplus")


def _round_up(n, m):
    return ((n + m - 1) // m) * m


def _apply_activation(y, activation):
    """Activation epilogue in f32 (v5e has no bf16 VPU/EUP)."""
    if activation is None:
        return y
    a = activation.lower()
    if a == "relu":
        return jnp.maximum(y, 0.0)
    if a == "tanh":
        return jnp.tanh(y)
    if a == "sigmoid":
        # sigmoid(y) == 0.5*tanh(0.5*y)+0.5 : tanh goes to the EUP, no VALU
        # divide on the latency-critical chain (per perf review).
        return 0.5 * jnp.tanh(0.5 * y) + 0.5
    if a == "softplus":
        # numerically-stable softplus, matches torch.nn.Softplus (beta=1)
        return jnp.where(y > 20.0, y, jnp.log1p(jnp.exp(jnp.minimum(y, 20.0))))
    raise ValueError(f"Unsupported activation '{activation}'")


# ---------------------------------------------------------------------------
# Fused kernel: x -> [policy(x) | value(x)] in one (batch, KF) slab.
# Both MLP stacks run as block-diagonal matmuls, fully unrolled in one call.
# ---------------------------------------------------------------------------
def _fused_a2c_kernel(x_ref, w_ref, b_ref, out_ref, *, acts, p_pad):
    # x_ref : (B, KF)   f32, true input in lanes [0, in_features), zeros after.
    # w_ref : (L, KF, KF) bf16 block-diagonal fused weights
    #         (policy block -> lanes [0, p_pad), value block -> [p_pad, KF)).
    # b_ref : (L, 1, KF) f32 fused biases.
    h = x_ref[...]                                    # f32 (mirrors x.float())
    for li, (act_p, act_v) in enumerate(acts):
        w = w_ref[li]                                 # static index -> free view
        b = b_ref[li]
        # bf16 operands into the MXU, f32 accumulation; epilogue stays f32.
        y = jnp.dot(h.astype(jnp.bfloat16), w,
                    preferred_element_type=jnp.float32) + b
        if act_p == act_v:
            h = _apply_activation(y, act_p)
        else:
            # vreg-aligned 128-lane halves, no cross-lane data movement.
            h = jnp.concatenate(
                [_apply_activation(y[:, :p_pad], act_p),
                 _apply_activation(y[:, p_pad:], act_v)], axis=-1)
    # NOTE: padded lanes hold activation(0); correctness relies on the next
    # layer's zero-padded weight rows and the wrapper's final slice.
    out_ref[...] = h.astype(out_ref.dtype)


# ---------------------------------------------------------------------------
# Config parsing / parameter init (mirrors CustomLinear.__init__ + nn.Linear)
# ---------------------------------------------------------------------------
def parse_layer_config(layer_config):
    layers = []
    i = 0
    while i < len(layer_config):
        in_f = layer_config[i]
        out_f = layer_config[i + 1]
        act = None
        if i + 2 < len(layer_config) and isinstance(layer_config[i + 2], str):
            act = layer_config[i + 2].lower()
            if act not in _SUPPORTED_ACTS:
                raise ValueError(f"Unsupported activation '{act}'")
            i += 3
        else:
            i += 2
        layers.append((in_f, out_f, act))
    return layers


def init_params(layer_config, key):
    """nn.Linear default init: uniform(-1/sqrt(fan_in), 1/sqrt(fan_in))."""
    layers = parse_layer_config(layer_config)
    params = []
    for (in_f, out_f, act) in layers:
        key, kw, kb = jax.random.split(key, 3)
        bound = 1.0 / float(in_f) ** 0.5
        # stored as [in_features, out_features] (transposed vs torch's [out, in])
        w = jax.random.uniform(kw, (in_f, out_f), jnp.float32, -bound, bound)
        b = jax.random.uniform(kb, (out_f,), jnp.float32, -bound, bound)
        params.append((w, b, act))
    return params


def _fused_layer_blocks(policy_params, value_params, in_features):
    """One-time prep: block-diagonal fused weights/biases, stacked per layer.

    Returns (w_stack [L,KF,KF] bf16, b_stack [L,1,KF] f32, acts, p_pad, p_out, v_out).
    """
    n_layers = max(len(policy_params), len(value_params))
    assert n_layers >= 1
    if policy_params and value_params:
        assert (policy_params[0][0].shape[0] == in_features
                and value_params[0][0].shape[0] == in_features), \
            "both stacks must consume the same input width"

    def stack_pad(params):
        widths = [in_features] + [w.shape[1] for (w, _, _) in params]
        return max(_round_up(n, 128) for n in widths)

    p_pad = stack_pad(policy_params)       # policy half: lanes [0, p_pad)
    v_pad = stack_pad(value_params)        # value  half: lanes [p_pad, kf)
    kf = p_pad + v_pad

    w_stack, b_stack, acts = [], [], []
    p_valid, v_valid = in_features, in_features
    for li in range(n_layers):
        wf = jnp.zeros((kf, kf), jnp.float32)
        bf = jnp.zeros((1, kf), jnp.float32)
        # --- policy block ---
        if li < len(policy_params):
            w, b, act_p = policy_params[li]
            in_f, out_f = w.shape
            assert in_f == p_valid, "policy layer widths must chain"
            wf = wf.at[0:in_f, 0:out_f].set(w)
            bf = bf.at[0, 0:out_f].set(b)
            p_valid = out_f
        else:  # shorter stack: identity pass-through on the valid width
            act_p = None
            wf = wf.at[0:p_valid, 0:p_valid].set(jnp.eye(p_valid, dtype=jnp.float32))
        # --- value block ---
        if li < len(value_params):
            w, b, act_v = value_params[li]
            in_f, out_f = w.shape
            assert in_f == v_valid, "value layer widths must chain"
            row0 = 0 if li == 0 else p_pad   # layer 0 reads the shared input lanes
            wf = wf.at[row0:row0 + in_f, p_pad:p_pad + out_f].set(w)
            bf = bf.at[0, p_pad:p_pad + out_f].set(b)
            v_valid = out_f
        else:
            act_v = None
            wf = wf.at[p_pad:p_pad + v_valid, p_pad:p_pad + v_valid].set(
                jnp.eye(v_valid, dtype=jnp.float32))
        w_stack.append(wf.astype(jnp.bfloat16))
        b_stack.append(bf)
        acts.append((act_p, act_v))

    return (jnp.stack(w_stack), jnp.stack(b_stack), tuple(acts),
            p_pad, p_valid, v_valid)


def make_a2c_forward(policy_params, value_params, batch, in_features):
    """Build a jitted forward(x) -> (policy(x), value(x)) around one fused kernel."""
    (w_stack, b_stack, acts, p_pad, p_out, v_out) = _fused_layer_blocks(
        policy_params, value_params, in_features)
    n_layers, kf, _ = w_stack.shape

    # advisory cost estimate (padded counts)
    flops = 2 * batch * kf * kf * n_layers
    transcendentals = 0
    for (act_p, act_v) in acts:
        if act_p in ("tanh", "sigmoid", "softplus"):
            transcendentals += batch * p_pad
        if act_v in ("tanh", "sigmoid", "softplus"):
            transcendentals += batch * (kf - p_pad)
    bytes_accessed = (batch * kf * 4          # padded x (f32)
                      + w_stack.size * 2      # bf16 weights
                      + b_stack.size * 4      # f32 biases
                      + batch * kf * 4)       # fused output slab

    kernel = functools.partial(_fused_a2c_kernel, acts=acts, p_pad=p_pad)

    vmem_spec = pl.BlockSpec(memory_space=pltpu.MemorySpace.VMEM)
    fused_call = pl.pallas_call(
        kernel,
        out_shape=jax.ShapeDtypeStruct((batch, kf), jnp.float32),
        in_specs=[vmem_spec, vmem_spec, vmem_spec],   # x, W-stack, b-stack
        out_specs=vmem_spec,
        cost_estimate=pl.CostEstimate(flops=flops,
                                      transcendentals=transcendentals,
                                      bytes_accessed=bytes_accessed),
    )

    @jax.jit
    def forward(x):
        # mirrors `x = x.float()`; pad once to the fused lane width so the
        # kernel reads a single unmasked lane-dense (batch, KF) slab.
        xf = jnp.zeros((batch, kf), jnp.float32).at[:, :in_features].set(
            x.astype(jnp.float32))
        out = fused_call(xf, w_stack, b_stack)
        return out[:, :p_out], out[:, p_pad:p_pad + v_out]

    return forward


if __name__ == "__main__":
    batch = 8
    # exercises relu / tanh / sigmoid / softplus across the two stacks
    policy_cfg = [32, 64, "relu", 64, 64, "tanh", 64, 16]
    value_cfg = [32, 64, "sigmoid", 64, 32, "softplus", 32, 1]

    key = jax.random.PRNGKey(0)
    key, kx, kp, kv = jax.random.split(key, 4)
    x = jax.random.normal(kx, (batch, policy_cfg[0]), jnp.float32)

    policy_params = init_params(policy_cfg, kp)
    value_params = init_params(value_cfg, kv)

    forward = make_a2c_forward(policy_params, value_params, batch, policy_cfg[0])
    pol, val = forward(x)
    pol, val = jax.block_until_ready((pol, val))

    assert pol.shape == (batch, 16) and pol.dtype == jnp.float32
    assert val.shape == (batch, 1) and val.dtype == jnp.float32

    # pure-JAX reference with the same bf16-operand / f32-accumulate numerics
    def ref_stack(xx, params):
        h = xx.astype(jnp.float32)
        for (w, b, act) in params:
            h = jnp.dot(h.astype(jnp.bfloat16), w.astype(jnp.bfloat16),
                        preferred_element_type=jnp.float32) + b
            if act == "relu":
                h = jnp.maximum(h, 0.0)
            elif act == "tanh":
                h = jnp.tanh(h)
            elif act == "sigmoid":
                h = jax.nn.sigmoid(h)
            elif act == "softplus":
                h = jax.nn.softplus(h)
        return h

    ref_pol = ref_stack(x, policy_params)
    ref_val = ref_stack(x, value_params)
    assert jnp.allclose(pol, ref_pol, atol=1e-2, rtol=1e-2), \
        float(jnp.max(jnp.abs(pol - ref_pol)))
    assert jnp.allclose(val, ref_val, atol=1e-2, rtol=1e-2), \
        float(jnp.max(jnp.abs(val - ref_val)))

    print("KERNEL_OK")
</pallas_src>

<mosaic_0001>
module attributes {stable_mosaic.version = 11 : i64} {
  func.func @_fused_a2c_kernel(%arg0: memref<8x256xf32, #tpu.memory_space<vmem>>, %arg1: memref<3x256x256xbf16, #tpu.memory_space<vmem>>, %arg2: memref<3x1x256xf32, #tpu.memory_space<vmem>>, %arg3: memref<8x256xf32, #tpu.memory_space<vmem>>) attributes {dimension_semantics = [], scalar_prefetch = 0 : i64, scratch_operands = 0 : i64, tpu.core_type = #tpu.core_type<tc>} {
    %c0 = arith.constant 0 : index
    %c0_0 = arith.constant 0 : index
    %0 = vector.load %arg0[%c0, %c0_0] : memref<8x256xf32, #tpu.memory_space<vmem>>, vector<8x256xf32>
    %c0_1 = arith.constant 0 : index
    %c0_2 = arith.constant 0 : index
    %c0_3 = arith.constant 0 : index
    %1 = vector.load %arg1[%c0_1, %c0_2, %c0_3] : memref<3x256x256xbf16, #tpu.memory_space<vmem>>, vector<1x256x256xbf16>
    %2 = vector.shape_cast %1 : vector<1x256x256xbf16> to vector<256x256xbf16>
    %c0_4 = arith.constant 0 : index
    %c0_5 = arith.constant 0 : index
    %c0_6 = arith.constant 0 : index
    %3 = vector.load %arg2[%c0_4, %c0_5, %c0_6] : memref<3x1x256xf32, #tpu.memory_space<vmem>>, vector<1x1x256xf32>
    %4 = vector.shape_cast %3 : vector<1x1x256xf32> to vector<1x256xf32>
    %5 = arith.truncf %0 : vector<8x256xf32> to vector<8x256xbf16>
    %cst = arith.constant dense<0.000000e+00> : vector<8x256xf32>
    %6 = tpu.matmul %5, %2, %cst {dimension_numbers = #tpu.dot_dimension_numbers<[1], [0], [0], [1], [0, 0, 1, 1], [], []>} : vector<8x256xbf16>, vector<256x256xbf16>, vector<8x256xf32> -> vector<8x256xf32>
    %7 = vector.broadcast %4 : vector<1x256xf32> to vector<8x256xf32>
    %8 = arith.addf %6, %7 : vector<8x256xf32>
    %9 = vector.extract_strided_slice %8 {offsets = [0, 0], sizes = [8, 128], strides = [1, 1]} : vector<8x256xf32> to vector<8x128xf32>
    %cst_7 = arith.constant 0.000000e+00 : f32
    %10 = vector.broadcast %cst_7 : f32 to vector<8x128xf32>
    %11 = arith.maximumf %9, %10 : vector<8x128xf32>
    %12 = vector.extract_strided_slice %8 {offsets = [0, 128], sizes = [8, 128], strides = [1, 1]} : vector<8x256xf32> to vector<8x128xf32>
    %cst_8 = arith.constant 5.000000e-01 : f32
    %13 = vector.broadcast %cst_8 : f32 to vector<8x128xf32>
    %14 = arith.mulf %13, %12 : vector<8x128xf32>
    %15 = math.tanh %14 : vector<8x128xf32>
    %cst_9 = arith.constant 5.000000e-01 : f32
    %16 = vector.broadcast %cst_9 : f32 to vector<8x128xf32>
    %17 = arith.mulf %16, %15 : vector<8x128xf32>
    %cst_10 = arith.constant 5.000000e-01 : f32
    %18 = vector.broadcast %cst_10 : f32 to vector<8x128xf32>
    %19 = arith.addf %17, %18 : vector<8x128xf32>
    %20 = tpu.concatenate %11, %19 in 1 : vector<8x128xf32>, vector<8x128xf32> -> vector<8x256xf32>
    %c1 = arith.constant 1 : index
    %c0_11 = arith.constant 0 : index
    %c0_12 = arith.constant 0 : index
    %21 = vector.load %arg1[%c1, %c0_11, %c0_12] : memref<3x256x256xbf16, #tpu.memory_space<vmem>>, vector<1x256x256xbf16>
    %22 = vector.shape_cast %21 : vector<1x256x256xbf16> to vector<256x256xbf16>
    %c1_13 = arith.constant 1 : index
    %c0_14 = arith.constant 0 : index
    %c0_15 = arith.constant 0 : index
    %23 = vector.load %arg2[%c1_13, %c0_14, %c0_15] : memref<3x1x256xf32, #tpu.memory_space<vmem>>, vector<1x1x256xf32>
    %24 = vector.shape_cast %23 : vector<1x1x256xf32> to vector<1x256xf32>
    %25 = arith.truncf %20 : vector<8x256xf32> to vector<8x256xbf16>
    %cst_16 = arith.constant dense<0.000000e+00> : vector<8x256xf32>
    %26 = tpu.matmul %25, %22, %cst_16 {dimension_numbers = #tpu.dot_dimension_numbers<[1], [0], [0], [1], [0, 0, 1, 1], [], []>} : vector<8x256xbf16>, vector<256x256xbf16>, vector<8x256xf32> -> vector<8x256xf32>
    %27 = vector.broadcast %24 : vector<1x256xf32> to vector<8x256xf32>
    %28 = arith.addf %26, %27 : vector<8x256xf32>
    %29 = vector.extract_strided_slice %28 {offsets = [0, 0], sizes = [8, 128], strides = [1, 1]} : vector<8x256xf32> to vector<8x128xf32>
    %30 = math.tanh %29 : vector<8x128xf32>
    %31 = vector.extract_strided_slice %28 {offsets = [0, 128], sizes = [8, 128], strides = [1, 1]} : vector<8x256xf32> to vector<8x128xf32>
    %cst_17 = arith.constant 2.000000e+01 : f32
    %32 = vector.broadcast %cst_17 : f32 to vector<8x128xf32>
    %33 = arith.cmpf ogt, %31, %32 : vector<8x128xf32>
    %cst_18 = arith.constant 2.000000e+01 : f32
    %34 = vector.broadcast %cst_18 : f32 to vector<8x128xf32>
    %35 = arith.minimumf %31, %34 : vector<8x128xf32>
    %36 = math.exp %35 : vector<8x128xf32>
    %37 = math.log1p %36 : vector<8x128xf32>
    %38 = arith.select %33, %31, %37 : vector<8x128xi1>, vector<8x128xf32>
    %39 = tpu.concatenate %30, %38 in 1 : vector<8x128xf32>, vector<8x128xf32> -> vector<8x256xf32>
    %c2 = arith.constant 2 : index
    %c0_19 = arith.constant 0 : index
    %c0_20 = arith.constant 0 : index
    %40 = vector.load %arg1[%c2, %c0_19, %c0_20] : memref<3x256x256xbf16, #tpu.memory_space<vmem>>, vector<1x256x256xbf16>
    %41 = vector.shape_cast %40 : vector<1x256x256xbf16> to vector<256x256xbf16>
    %c2_21 = arith.constant 2 : index
    %c0_22 = arith.constant 0 : index
    %c0_23 = arith.constant 0 : index
    %42 = vector.load %arg2[%c2_21, %c0_22, %c0_23] : memref<3x1x256xf32, #tpu.memory_space<vmem>>, vector<1x1x256xf32>
    %43 = vector.shape_cast %42 : vector<1x1x256xf32> to vector<1x256xf32>
    %44 = arith.truncf %39 : vector<8x256xf32> to vector<8x256xbf16>
    %cst_24 = arith.constant dense<0.000000e+00> : vector<8x256xf32>
    %45 = tpu.matmul %44, %41, %cst_24 {dimension_numbers = #tpu.dot_dimension_numbers<[1], [0], [0], [1], [0, 0, 1, 1], [], []>} : vector<8x256xbf16>, vector<256x256xbf16>, vector<8x256xf32> -> vector<8x256xf32>
    %46 = vector.broadcast %43 : vector<1x256xf32> to vector<8x256xf32>
    %47 = arith.addf %45, %46 : vector<8x256xf32>
    %c0_25 = arith.constant 0 : index
    %c0_26 = arith.constant 0 : index
    %48 = vector.load %arg3[%c0_25, %c0_26] : memref<8x256xf32, #tpu.memory_space<vmem>>, vector<8x256xf32>
    tpu.vector_store %arg3[%c0_25, %c0_26], %47 {strides = array<i32>} : memref<8x256xf32, #tpu.memory_space<vmem>>, vector<8x256xf32>,
    return
  }
}

</mosaic_0001>

<bundles_post_ra>
// kernel: forward.1
= control target key start
LH: loop header
LB: loop body
LE: loop exit
PB: predicated region body
PF: predicated region fallthrough
CT: control target
= control target key end

     0   :  { %8 = vsyncpa [#allocation3], 0  ;;  %s1338_s15 = smov [#allocation2]   ;;  %s1339_s17 = smov 128   ;;  %s1385_s0 = inlined_call_operand.vmem [shape: f32[8,256], index: 0, kind: input, shape index: {}]   ;;  %s1386_s1 = inlined_call_operand.hbm [shape: bf16[3,256,256], index: 1, kind: input, shape index: {}]   ;;  %s1387_s2 = inlined_call_operand.vmem [shape: f32[3,1,256], index: 2, kind: input, shape index: {}]   ;;  %s1388_s3 = inlined_call_operand.vmem [shape: f32[8,256], index: 3, kind: output, shape index: {}]  }
   0x1   :  { %s15_s14 = sshll.u32 %s1386_s1, 4  ;;  %s17_s16 = sshll.u32 %s1338_s15, 4  ;;  %s16_s14 = int_to_ptr.hbm [resolvable:$true] %s15_s14  ;;  %s18_s16 = int_to_ptr.vmem [resolvable:$true] %s17_s16 }
   0x2   :  { %s1340_s18 = smov 8  }
   0x3   :  { %23 = dma.hbm_to_vmem [thread:$0]  %s16_s14, 12288, %s18_s16, [#allocation3], %s1339_s17, %s1339_s17, %s1340_s18  }
   0x4   :  { %1336 = dma.done.wait [#allocation3], 12288  }
   0x5   :  { %1337 = vsyncadd [#allocation3], 4294955008  ;;  %v1219_v0 = vld [vmem:[#allocation2 + $0x74] sm:$0xf]  ;;  %v879_v1 = vld [vmem:[#allocation2 + $0x78] sm:$0xf0] }
   0x6   :  { %v1235_v2 = vld [vmem:[#allocation2 + $0xf4] sm:$0xf]  ;;  %v882_v3 = vor.u32 %v1219_v0, %v879_v1  ;;  %v943_v4 = vld [vmem:[#allocation2 + $0xf8] sm:$0xf0]  ;;  %v1217_v5 = vld [vmem:[#allocation2 + $0x64] sm:$0xf] }
   0x7   :  { %v871_v6 = vld [vmem:[#allocation2 + $0x68] sm:$0xf0]  ;;  %v946_v7 = vor.u32 %v1235_v2, %v943_v4  ;;  %v1233_v8 = vld [vmem:[#allocation2 + $0xe4] sm:$0xf]  ;;  %v877_v10 = vld [vmem:[#allocation2 + $0x70] sm:$0xf] }
   0x8   :  { %v935_v9 = vld [vmem:[#allocation2 + $0xe8] sm:$0xf0]  ;;  %258 = vmatpush.bf16.msra.mxu2 %v882_v3  ;;  %v874_v11 = vor.u32 %v1217_v5, %v871_v6  ;;  %v1220_v12 = vld [vmem:[#allocation2 + $0x74] sm:$0xf0]  ;;  %v1215_v13 = vld [vmem:[#allocation2 + $0x54] sm:$0xf] }
   0x9   :  { %v863_v14 = vld [vmem:[#allocation2 + $0x58] sm:$0xf0]  ;;  %271 = vmatpush.bf16.msra.mxu3 %v946_v7  ;;  %v938_v15 = vor.u32 %v1233_v8, %v935_v9  ;;  %v878_v16 = vor.u32 %v1220_v12, %v877_v10  ;;  %v1231_v17 = vld [vmem:[#allocation2 + $0xd4] sm:$0xf]  ;;  %v941_v19 = vld [vmem:[#allocation2 + $0xf0] sm:$0xf] }
   0xa   :  { %v927_v18 = vld [vmem:[#allocation2 + $0xd8] sm:$0xf0]  ;;  %v1236_v20 = vld [vmem:[#allocation2 + $0xf4] sm:$0xf0]  ;;  %v869_v21 = vld [vmem:[#allocation2 + $0x60] sm:$0xf]  ;;  %v866_v25 = vor.u32 %v1215_v13, %v863_v14 }
   0xb   :  { %v1218_v22 = vld [vmem:[#allocation2 + $0x64] sm:$0xf0]  ;;  %232 = vmatpush.bf16.msra.mxu0 %v878_v16  ;;  %v942_v23 = vor.u32 %v1236_v20, %v941_v19  ;;  %v1213_v26 = vld [vmem:[#allocation2 + $0x44] sm:$0xf]  ;;  %v933_v27 = vld [vmem:[#allocation2 + $0xe0] sm:$0xf]  ;;  %v930_v29 = vor.u32 %v1231_v17, %v927_v18 }
   0xc   :  { %v870_v24 = vor.u32 %v1218_v22, %v869_v21  ;;  %259 = vmatpush.bf16.msra.mxu2 %v874_v11  ;;  %v1234_v28 = vld [vmem:[#allocation2 + $0xe4] sm:$0xf0]  ;;  %v855_v30 = vld [vmem:[#allocation2 + $0x48] sm:$0xf0]  ;;  %v861_v32 = vld [vmem:[#allocation2 + $0x50] sm:$0xf] }
   0xd   :  { %272 = vmatpush.bf16.msra.mxu3 %v938_v15  ;;  %245 = vmatpush.bf16.msra.mxu1 %v942_v23  ;;  %v934_v31 = vor.u32 %v1234_v28, %v933_v27  ;;  %v1216_v33 = vld [vmem:[#allocation2 + $0x54] sm:$0xf0]  ;;  %v1229_v34 = vld [vmem:[#allocation2 + $0xc4] sm:$0xf]  ;;  %v919_v35 = vld [vmem:[#allocation2 + $0xc8] sm:$0xf0]  ;;  %v858_v39 = vor.u32 %v1213_v26, %v855_v30 }
   0xe   :  { %v862_v36 = vor.u32 %v1216_v33, %v861_v32  ;;  %v925_v37 = vld [vmem:[#allocation2 + $0xd0] sm:$0xf]  ;;  %v1232_v38 = vld [vmem:[#allocation2 + $0xd4] sm:$0xf0]  ;;  %v853_v40 = vld [vmem:[#allocation2 + $0x40] sm:$0xf]  ;;  %v922_v42 = vor.u32 %v1229_v34, %v919_v35 }
   0xf   :  { %233 = vmatpush.bf16.msra.mxu0 %v870_v24  ;;  %v1214_v41 = vld [vmem:[#allocation2 + $0x44] sm:$0xf0]  ;;  %v1211_v43 = vld [vmem:[#allocation2 + $0x34] sm:$0xf]  ;;  %v847_v44 = vld [vmem:[#allocation2 + $0x38] sm:$0xf0]  ;;  %v926_v46 = vor.u32 %v1232_v38, %v925_v37 }
  0x10   :  { %260 = vmatpush.bf16.msra.mxu2 %v866_v25  ;;  %v1227_v45 = vld [vmem:[#allocation2 + $0xb4] sm:$0xf]  ;;  %v911_v47 = vld [vmem:[#allocation2 + $0xb8] sm:$0xf0]  ;;  %v917_v48 = vld [vmem:[#allocation2 + $0xc0] sm:$0xf]  ;;  %v854_v50 = vor.u32 %v1214_v41, %v853_v40  ;;  %v850_v51 = vor.u32 %v1211_v43, %v847_v44 }
  0x11   :  { %273 = vmatpush.bf16.msra.mxu3 %v930_v29  ;;  %246 = vmatpush.bf16.msra.mxu1 %v934_v31  ;;  %v1230_v49 = vld [vmem:[#allocation2 + $0xc4] sm:$0xf0]  ;;  %v845_v52 = vld [vmem:[#allocation2 + $0x30] sm:$0xf]  ;;  %v1212_v53 = vld [vmem:[#allocation2 + $0x34] sm:$0xf0]  ;;  %v914_v54 = vor.u32 %v1227_v45, %v911_v47 }
  0x12   :  { %v1209_v55 = vld [vmem:[#allocation2 + $0x24] sm:$0xf]  ;;  %v839_v56 = vld [vmem:[#allocation2 + $0x28] sm:$0xf0]  ;;  %v918_v58 = vor.u32 %v1230_v49, %v917_v48  ;;  %v909_v60 = vld [vmem:[#allocation2 + $0xb0] sm:$0xf]  ;;  %v846_v62 = vor.u32 %v1212_v53, %v845_v52 }
  0x13   :  { %234 = vmatpush.bf16.msra.mxu0 %v862_v36  ;;  %v1225_v57 = vld [vmem:[#allocation2 + $0xa4] sm:$0xf]  ;;  %v903_v59 = vld [vmem:[#allocation2 + $0xa8] sm:$0xf0]  ;;  %v1228_v61 = vld [vmem:[#allocation2 + $0xb4] sm:$0xf0]  ;;  %v842_v63 = vor.u32 %v1209_v55, %v839_v56 }
  0x14   :  { %261 = vmatpush.bf16.msra.mxu2 %v858_v39  ;;  %v837_v0 = vld [vmem:[#allocation2 + $0x20] sm:$0xf]  ;;  %v1210_v1 = vld [vmem:[#allocation2 + $0x24] sm:$0xf0]  ;;  %v906_v2 = vor.u32 %v1225_v57, %v903_v59  ;;  %v1207_v3 = vld [vmem:[#allocation2 + $0x14] sm:$0xf]  ;;  %v910_v6 = vor.u32 %v1228_v61, %v909_v60 }
  0x15   :  { %274 = vmatpush.bf16.msra.mxu3 %v922_v42  ;;  %247 = vmatpush.bf16.msra.mxu1 %v926_v46  ;;  %v831_v4 = vld [vmem:[#allocation2 + $0x18] sm:$0xf0]  ;;  %v1223_v5 = vld [vmem:[#allocation2 + $0x94] sm:$0xf]  ;;  %v901_v8 = vld [vmem:[#allocation2 + $0xa0] sm:$0xf]  ;;  %v838_v10 = vor.u32 %v1210_v1, %v837_v0 }
  0x16   :  { %v895_v7 = vld [vmem:[#allocation2 + $0x98] sm:$0xf0]  ;;  %v1226_v9 = vld [vmem:[#allocation2 + $0xa4] sm:$0xf0]  ;;  %v834_v11 = vor.u32 %v1207_v3, %v831_v4  ;;  %v1205_v12 = vld [vmem:[#allocation2 + $0x4] sm:$0xf] }
  0x17   :  { %235 = vmatpush.bf16.msra.mxu0 %v854_v50  ;;  %v829_v13 = vld [vmem:[#allocation2 + $0x10] sm:$0xf]  ;;  %v1208_v14 = vld [vmem:[#allocation2 + $0x14] sm:$0xf0]  ;;  %v898_v15 = vor.u32 %v1223_v5, %v895_v7  ;;  %v823_v16 = vld [vmem:[#allocation2 + $0x8] sm:$0xf0]  ;;  %v902_v19 = vor.u32 %v1226_v9, %v901_v8 }
  0x18   :  { %262 = vmatpush.bf16.msra.mxu2 %v850_v51  ;;  %v1221_v17 = vld [vmem:[#allocation2 + $0x84] sm:$0xf]  ;;  %v887_v18 = vld [vmem:[#allocation2 + $0x88] sm:$0xf0]  ;;  %v893_v21 = vld [vmem:[#allocation2 + $0x90] sm:$0xf]  ;;  %v830_v23 = vor.u32 %v1208_v14, %v829_v13  ;;  %v826_v27 = vor.u32 %v1205_v12, %v823_v16 }
  0x19   :  { %275 = vmatpush.bf16.msra.mxu3 %v914_v54  ;;  %248 = vmatpush.bf16.msra.mxu1 %v918_v58  ;;  %v30_v20 = vld [vmem:[%s1385_s0] sm:$0xff]  ;;  %v1224_v22 = vld [vmem:[#allocation2 + $0x94] sm:$0xf0]  ;;  %v1251_v24 = vld [vmem:[#allocation2 + $0x174] sm:$0xf]  ;;  %v890_v31 = vor.u32 %v1221_v17, %v887_v18 }
  0x1a   :  { %v1008_v25 = vld [vmem:[#allocation2 + $0x178] sm:$0xf0]  ;;  %v1267_v26 = vld [vmem:[#allocation2 + $0x1f4] sm:$0xf]  ;;  %v821_v28 = vld [vmem:[#allocation2] sm:$0xf]  ;;  %v894_v33 = vor.u32 %v1224_v22, %v893_v21  ;;  %v65_v40 = vpack.c.bf16 %v30_v20, %v30_v20 }
  0x1b   :  { %236 = vmatpush.bf16.msra.mxu0 %v846_v62  ;;  %v1206_v29 = vld [vmem:[#allocation2 + $0x4] sm:$0xf0]  ;;  %v1072_v30 = vld [vmem:[#allocation2 + $0x1f8] sm:$0xf0]  ;;  %v1006_v34 = vld [vmem:[#allocation2 + $0x170] sm:$0xf]  ;;  %v1011_v38 = vor.u32 %v1251_v24, %v1008_v25 }
  0x1c   :  { %263 = vmatpush.bf16.msra.mxu2 %v842_v63  ;;  %v31_v32 = vld [vmem:[%s1385_s0 + $0x8] sm:$0xff]  ;;  %v1252_v35 = vld [vmem:[#allocation2 + $0x174] sm:$0xf0]  ;;  %v885_v36 = vld [vmem:[#allocation2 + $0x80] sm:$0xf]  ;;  %v1075_v39 = vor.u32 %v1267_v26, %v1072_v30  ;;  %v822_v41 = vor.u32 %v1206_v29, %v821_v28 }
  0x1d   :  { %276 = vmatpush.bf16.msra.mxu3 %v906_v2  ;;  %249 = vmatpush.bf16.msra.mxu1 %v910_v6  ;;  %v1222_v37 = vld [vmem:[#allocation2 + $0x84] sm:$0xf0]  ;;  %v1249_v42 = vld [vmem:[#allocation2 + $0x164] sm:$0xf]  ;;  %v1000_v43 = vld [vmem:[#allocation2 + $0x168] sm:$0xf0]  ;;  %v66_v45 = vpack.c.bf16 %v31_v32, %v31_v32  ;;  %v1007_v46 = vor.u32 %v1252_v35, %v1006_v34 }
  0x1e   :  { %v1070_v44 = vld [vmem:[#allocation2 + $0x1f0] sm:$0xf]  ;;  %v1268_v47 = vld [vmem:[#allocation2 + $0x1f4] sm:$0xf0]  ;;  %v1265_v48 = vld [vmem:[#allocation2 + $0x1e4] sm:$0xf]  ;;  %v886_v50 = vor.u32 %v1222_v37, %v885_v36  ;;  %v1003_v53 = vor.u32 %v1249_v42, %v1000_v43 }
  0x1f   :  { %237 = vmatpush.bf16.msra.mxu0 %v838_v10  ;;  %v1064_v49 = vld [vmem:[#allocation2 + $0x1e8] sm:$0xf0]  ;;  %v998_v51 = vld [vmem:[#allocation2 + $0x160] sm:$0xf]  ;;  %v1250_v52 = vld [vmem:[#allocation2 + $0x164] sm:$0xf0]  ;;  %v1071_v56 = vor.u32 %v1268_v47, %v1070_v44 }
  0x20   :  { %264 = vmatpush.bf16.msra.mxu2 %v834_v11  ;;  %v1247_v54 = vld [vmem:[#allocation2 + $0x154] sm:$0xf]  ;;  %v992_v55 = vld [vmem:[#allocation2 + $0x158] sm:$0xf0]  ;;  %v1062_v57 = vld [vmem:[#allocation2 + $0x1e0] sm:$0xf]  ;;  %v1067_v58 = vor.u32 %v1265_v48, %v1064_v49  ;;  %v999_v59 = vor.u32 %v1250_v52, %v998_v51 }
  0x21   :  { %277 = vmatpush.bf16.msra.mxu3 %v898_v15  ;;  %250 = vmatpush.bf16.msra.mxu1 %v902_v19  ;;  %v1266_v60 = vld [vmem:[#allocation2 + $0x1e4] sm:$0xf0]  ;;  %v1263_v61 = vld [vmem:[#allocation2 + $0x1d4] sm:$0xf]  ;;  %v1056_v62 = vld [vmem:[#allocation2 + $0x1d8] sm:$0xf0]  ;;  %v995_v1 = vor.u32 %v1247_v54, %v992_v55 }
  0x22   :  { %v990_v63 = vld [vmem:[#allocation2 + $0x150] sm:$0xf]  ;;  %v1248_v0 = vld [vmem:[#allocation2 + $0x154] sm:$0xf0]  ;;  %v1245_v2 = vld [vmem:[#allocation2 + $0x144] sm:$0xf]  ;;  %v1063_v4 = vor.u32 %v1266_v60, %v1062_v57  ;;  %v1059_v5 = vor.u32 %v1263_v61, %v1056_v62 }
  0x23   :  { %238 = vmatpush.bf16.msra.mxu0 %v830_v23  ;;  %v984_v3 = vld [vmem:[#allocation2 + $0x148] sm:$0xf0]  ;;  %v991_v6 = vor.u32 %v1248_v0, %v990_v63  ;;  %v1054_v7 = vld [vmem:[#allocation2 + $0x1d0] sm:$0xf]  ;;  %v1264_v8 = vld [vmem:[#allocation2 + $0x1d4] sm:$0xf0] }
  0x24   :  { %265 = vmatpush.bf16.msra.mxu2 %v826_v27  ;;  %v982_v9 = vld [vmem:[#allocation2 + $0x140] sm:$0xf]  ;;  %v1246_v10 = vld [vmem:[#allocation2 + $0x144] sm:$0xf0]  ;;  %v987_v11 = vor.u32 %v1245_v2, %v984_v3  ;;  %v1243_v12 = vld [vmem:[#allocation2 + $0x134] sm:$0xf]  ;;  %v1055_v14 = vor.u32 %v1264_v8, %v1054_v7 }
  0x25   :  { %278 = vmatpush.bf16.msra.mxu3 %v890_v31  ;;  %251 = vmatpush.bf16.msra.mxu1 %v894_v33  ;;  %v976_v13 = vld [vmem:[#allocation2 + $0x138] sm:$0xf0]  ;;  %v983_v15 = vor.u32 %v1246_v10, %v982_v9  ;;  %v974_v16 = vld [vmem:[#allocation2 + $0x130] sm:$0xf]  ;;  %v1244_v17 = vld [vmem:[#allocation2 + $0x134] sm:$0xf0] }
  0x26   :  { %v979_v18 = vor.u32 %v1243_v12, %v976_v13  ;;  %v1241_v19 = vld [vmem:[#allocation2 + $0x124] sm:$0xf]  ;;  %v968_v20 = vld [vmem:[#allocation2 + $0x128] sm:$0xf0]  ;;  %v975_v21 = vor.u32 %v1244_v17, %v974_v16  ;;  %v966_v22 = vld [vmem:[#allocation2 + $0x120] sm:$0xf] }
  0x27   :  { %266 = vmatmul.bf16.vlgmr.msra.gmra.mxu2 %v65_v40  ;;  %239 = vmatpush.bf16.msra.mxu0 %v822_v41  ;;  %v1242_v23 = vld [vmem:[#allocation2 + $0x124] sm:$0xf0]  ;;  %v971_v24 = vor.u32 %v1241_v19, %v968_v20  ;;  %v1046_v26 = vld [vmem:[#allocation2 + $0x1c0] sm:$0xf]  ;;  %v1261_v28 = vld [vmem:[#allocation2 + $0x1c4] sm:$0xf] }
  0x28   :  { %517 = vmatpush.bf16.msrb.mxu2 %v1011_v38  ;;  %279 = vmatmul.bf16.vlgmr.msra.gmra.mxu3 %v66_v45  ;;  %v967_v25 = vor.u32 %v1242_v23, %v966_v22  ;;  %v1262_v27 = vld [vmem:[#allocation2 + $0x1c4] sm:$0xf0]  ;;  %v1048_v30 = vld [vmem:[#allocation2 + $0x1c8] sm:$0xf0]  ;;  %v958_v32 = vld [vmem:[#allocation2 + $0x110] sm:$0xf] }
  0x29   :  { %530 = vmatpush.bf16.msrb.mxu3 %v1075_v39  ;;  %252 = vmatpush.bf16.msra.mxu1 %v886_v50  ;;  %v1047_v29 = vor.u32 %v1262_v27, %v1046_v26  ;;  %v1051_v31 = vor.u32 %v1261_v28, %v1048_v30  ;;  %v1240_v33 = vld [vmem:[#allocation2 + $0x114] sm:$0xf0]  ;;  %v1239_v35 = vld [vmem:[#allocation2 + $0x114] sm:$0xf]  ;;  %v960_v36 = vld [vmem:[#allocation2 + $0x118] sm:$0xf0] }
  0x2a   :  { %240 = vmatmul.bf16.vlgmr.msra.gmra.mxu0 %v65_v40  ;;  %v959_v34 = vor.u32 %v1240_v33, %v958_v32  ;;  %v963_v37 = vor.u32 %v1239_v35, %v960_v36  ;;  %v1038_v38 = vld [vmem:[#allocation2 + $0x1b0] sm:$0xf]  ;;  %v1260_v39 = vld [vmem:[#allocation2 + $0x1b4] sm:$0xf0]  ;;  %v1259_v40 = vld [vmem:[#allocation2 + $0x1b4] sm:$0xf] }
  0x2b   :  { %491 = vmatpush.bf16.msrb.mxu0 %v1007_v46  ;;  %v1039_v41 = vor.u32 %v1260_v39, %v1038_v38  ;;  %v1040_v42 = vld [vmem:[#allocation2 + $0x1b8] sm:$0xf0]  ;;  %v950_v44 = vld [vmem:[#allocation2 + $0x100] sm:$0xf]  ;;  %v1237_v46 = vld [vmem:[#allocation2 + $0x104] sm:$0xf] }
  0x2c   :  { %518 = vmatpush.bf16.msrb.mxu2 %v1003_v53  ;;  %253 = vmatmul.bf16.vlgmr.msra.gmra.mxu1 %v66_v45  ;;  %v1043_v43 = vor.u32 %v1259_v40, %v1040_v42  ;;  %v1238_v45 = vld [vmem:[#allocation2 + $0x104] sm:$0xf0]  ;;  %v952_v48 = vld [vmem:[#allocation2 + $0x108] sm:$0xf0]  ;;  %v1030_v50 = vld [vmem:[#allocation2 + $0x1a0] sm:$0xf] }
  0x2d   :  { %504 = vmatpush.bf16.msrb.mxu1 %v1071_v56  ;;  %531 = vmatpush.bf16.msrb.mxu3 %v1067_v58  ;;  %v951_v47 = vor.u32 %v1238_v45, %v950_v44  ;;  %v955_v49 = vor.u32 %v1237_v46, %v952_v48  ;;  %v1258_v51 = vld [vmem:[#allocation2 + $0x1a4] sm:$0xf0]  ;;  %v1257_v52 = vld [vmem:[#allocation2 + $0x1a4] sm:$0xf]  ;;  %v1032_v54 = vld [vmem:[#allocation2 + $0x1a8] sm:$0xf0] }
  0x2e   :  { %v1031_v53 = vor.u32 %v1258_v51, %v1030_v50  ;;  %v1035_v55 = vor.u32 %v1257_v52, %v1032_v54  ;;  %v1022_v56 = vld [vmem:[#allocation2 + $0x190] sm:$0xf]  ;;  %v1256_v57 = vld [vmem:[#allocation2 + $0x194] sm:$0xf0]  ;;  %v1255_v58 = vld [vmem:[#allocation2 + $0x194] sm:$0xf] }
  0x2f   :  { %492 = vmatpush.bf16.msrb.mxu0 %v999_v59  ;;  %v1023_v59 = vor.u32 %v1256_v57, %v1022_v56  ;;  %v1024_v60 = vld [vmem:[#allocation2 + $0x198] sm:$0xf0]  ;;  %v1014_v62 = vld [vmem:[#allocation2 + $0x180] sm:$0xf]  ;;  %v1254_v63 = vld [vmem:[#allocation2 + $0x184] sm:$0xf0] }
  0x30   :  { %519 = vmatpush.bf16.msrb.mxu2 %v995_v1  ;;  %v1027_v61 = vor.u32 %v1255_v58, %v1024_v60  ;;  %v1253_v0 = vld [vmem:[#allocation2 + $0x184] sm:$0xf]  ;;  %v1015_v1 = vor.u32 %v1254_v63, %v1014_v62  ;;  %v1016_v2 = vld [vmem:[#allocation2 + $0x188] sm:$0xf0]  ;;  %v1137_v8 = vld [vmem:[#allocation2 + $0x278] sm:$0xf0] }
  0x31   :  { %505 = vmatpush.bf16.msrb.mxu1 %v1063_v4  ;;  %532 = vmatpush.bf16.msrb.mxu3 %v1059_v5  ;;  %v1019_v3 = vor.u32 %v1253_v0, %v1016_v2  ;;  %v1135_v4 = vld [vmem:[#allocation2 + $0x270] sm:$0xf]  ;;  %v1284_v5 = vld [vmem:[#allocation2 + $0x274] sm:$0xf0]  ;;  %v1127_v9 = vld [vmem:[#allocation2 + $0x260] sm:$0xf] }
  0x32   :  { %v1136_v7 = vor.u32 %v1284_v5, %v1135_v4  ;;  %v1282_v10 = vld [vmem:[#allocation2 + $0x264] sm:$0xf0]  ;;  %v1281_v12 = vld [vmem:[#allocation2 + $0x264] sm:$0xf]  ;;  %v1129_v13 = vld [vmem:[#allocation2 + $0x268] sm:$0xf0] }
  0x33   :  { %493 = vmatpush.bf16.msrb.mxu0 %v991_v6  ;;  %v1283_v6 = vld [vmem:[#allocation2 + $0x274] sm:$0xf]  ;;  %v1132_v16 = vor.u32 %v1281_v12, %v1129_v13  ;;  %v1119_v17 = vld [vmem:[#allocation2 + $0x250] sm:$0xf]  ;;  %v1121_v20 = vld [vmem:[#allocation2 + $0x258] sm:$0xf0] }
  0x34   :  { %520 = vmatpush.bf16.msrb.mxu2 %v987_v11  ;;  %v1140_v11 = vor.u32 %v1283_v6, %v1137_v8  ;;  %v1279_v19 = vld [vmem:[#allocation2 + $0x254] sm:$0xf]  ;;  %v1111_v44 = vld [vmem:[#allocation2 + $0x240] sm:$0xf]  ;;  %v1278_v45 = vld [vmem:[#allocation2 + $0x244] sm:$0xf0] }
  0x35   :  { %506 = vmatpush.bf16.msrb.mxu1 %v1055_v14  ;;  %533 = vmatpush.bf16.msrb.mxu3 %v1051_v31  ;;  %v64_v14 = vld [vmem:[%s1387_s2] sm:$0x3]  ;;  %v1124_v23 = vor.u32 %v1279_v19, %v1121_v20  ;;  %v1277_v46 = vld [vmem:[#allocation2 + $0x244] sm:$0xf]  ;;  %v1113_v48 = vld [vmem:[#allocation2 + $0x248] sm:$0xf0] }
  0x36   :  { %v1103_v50 = vld [vmem:[#allocation2 + $0x230] sm:$0xf]  ;;  %v1276_v51 = vld [vmem:[#allocation2 + $0x234] sm:$0xf0]  ;;  %v1275_v52 = vld [vmem:[#allocation2 + $0x234] sm:$0xf] }
  0x37   :  { %494 = vmatpush.bf16.msrb.mxu0 %v983_v15  ;;  %v1128_v15 = vor.u32 %v1282_v10, %v1127_v9  ;;  %v1105_v54 = vld [vmem:[#allocation2 + $0x238] sm:$0xf0]  ;;  %v1095_v56 = vld [vmem:[#allocation2 + $0x220] sm:$0xf]  ;;  %v1274_v57 = vld [vmem:[#allocation2 + $0x224] sm:$0xf0] }
  0x38   :  { %521 = vmatpush.bf16.msrb.mxu2 %v979_v18  ;;  %v1280_v18 = vld [vmem:[#allocation2 + $0x254] sm:$0xf0]  ;;  %v1273_v58 = vld [vmem:[#allocation2 + $0x224] sm:$0xf]  ;;  %v1097_v60 = vld [vmem:[#allocation2 + $0x228] sm:$0xf0] }
  0x39   :  { %507 = vmatpush.bf16.msrb.mxu1 %v1047_v29  ;;  %534 = vmatpush.bf16.msrb.mxu3 %v1043_v43  ;;  %v1120_v22 = vor.u32 %v1280_v18, %v1119_v17  ;;  %v1199_v62 = vld [vmem:[#allocation2 + $0x2f0] sm:$0xf]  ;;  %v1300_v63 = vld [vmem:[#allocation2 + $0x2f4] sm:$0xf0]  ;;  %v1299_v0 = vld [vmem:[#allocation2 + $0x2f4] sm:$0xf] }
  0x3a   :  { %v1201_v2 = vld [vmem:[#allocation2 + $0x2f8] sm:$0xf0]  ;;  %v1272_v4 = vld [vmem:[#allocation2 + $0x214] sm:$0xf0]  ;;  %v1191_v10 = vld [vmem:[#allocation2 + $0x2e0] sm:$0xf] }
  0x3b   :  { %495 = vmatpush.bf16.msrb.mxu0 %v975_v21  ;;  %v68_v21 = vperm.slane %v64_v14, 0  ;;  %v1204_v5 = vor.u32 %v1299_v0, %v1201_v2  ;;  %v1089_v8 = vld [vmem:[#allocation2 + $0x218] sm:$0xf0]  ;;  %v1297_v12 = vld [vmem:[#allocation2 + $0x2e4] sm:$0xf] }
  0x3c   :  { %522 = vmatpush.bf16.msrb.mxu2 %v971_v24  ;;  %v69_v24 = vperm.slane %v64_v14, 1  ;;  %v1193_v14 = vld [vmem:[#allocation2 + $0x2e8] sm:$0xf0]  ;;  %v1269_v19 = vld [vmem:[#allocation2 + $0x204] sm:$0xf] }
  0x3d   :  { %508 = vmatpush.bf16.msrb.mxu1 %v1039_v41  ;;  %535 = vmatpush.bf16.msrb.mxu3 %v1035_v55  ;;  %v1108_v55 = vor.u32 %v1275_v52, %v1105_v54  ;;  %v1196_v17 = vor.u32 %v1297_v12, %v1193_v14  ;;  %v1081_v20 = vld [vmem:[#allocation2 + $0x208] sm:$0xf0]  ;;  %v1288_v52 = vld [vmem:[#allocation2 + $0x294] sm:$0xf0] }
  0x3f   :  { %496 = vmatpush.bf16.msrb.mxu0 %v967_v25 }
  0x40   :  { %523 = vmatpush.bf16.msrb.mxu2 %v963_v37 }
  0x41   :  { %509 = vmatpush.bf16.msrb.mxu1 %v1031_v53  ;;  %536 = vmatpush.bf16.msrb.mxu3 %v1027_v61  ;;  %v1104_v53 = vor.u32 %v1276_v51, %v1103_v50  ;;  %v1100_v61 = vor.u32 %v1273_v58, %v1097_v60  ;;  %v1151_v51 = vld [vmem:[#allocation2 + $0x290] sm:$0xf]  ;;  %v1143_v58 = vld [vmem:[#allocation2 + $0x280] sm:$0xf]  ;;  %v1285_v60 = vld [vmem:[#allocation2 + $0x284] sm:$0xf] }
  0x42   :  { %v1152_v54 = vor.u32 %v1288_v52, %v1151_v51 }
  0x43   :  { %497 = vmatpush.bf16.msrb.mxu0 %v959_v34 }
  0x44   :  { %524 = vmatpush.bf16.msrb.mxu2 %v955_v49  ;;  %v1116_v49 = vor.u32 %v1277_v46, %v1113_v48  ;;  %v1161_v46 = vld [vmem:[#allocation2 + $0x2a8] sm:$0xf0] }
  0x45   :  { %510 = vmatpush.bf16.msrb.mxu1 %v1023_v59  ;;  %537 = vmatpush.bf16.msrb.mxu3 %v1019_v3  ;;  %v1096_v59 = vor.u32 %v1274_v57, %v1095_v56  ;;  %v1087_v3 = vld [vmem:[#allocation2 + $0x210] sm:$0xf] }
  0x46   :  { %v1088_v6 = vor.u32 %v1272_v4, %v1087_v3 }
  0x47   :  { %498 = vmatpush.bf16.msrb.mxu0 %v951_v47  ;;  %v1112_v47 = vor.u32 %v1278_v45, %v1111_v44  ;;  %v1289_v44 = vld [vmem:[#allocation2 + $0x2a4] sm:$0xf] }
  0x48   :  { %786 = vmatpush.bf16.msra.mxu2 %v1140_v11  ;;  %v1298_v11 = vld [vmem:[#allocation2 + $0x2e4] sm:$0xf0]  ;;  %v1164_v48 = vor.u32 %v1289_v44, %v1161_v46 }
  0x49   :  { %511 = vmatpush.bf16.msrb.mxu1 %v1015_v1  ;;  %v1200_v1 = vor.u32 %v1300_v63, %v1199_v62  ;;  %799 = vmatpush.bf16.msra.mxu3 %v1204_v5  ;;  %v1192_v13 = vor.u32 %v1298_v11, %v1191_v10  ;;  %v1145_v63 = vld [vmem:[#allocation2 + $0x288] sm:$0xf0] }
  0x4a   :  { %v1148_v2 = vor.u32 %v1285_v60, %v1145_v63 }
  0x4b   :  { %760 = vmatpush.bf16.msra.mxu0 %v1136_v7  ;;  %v1271_v7 = vld [vmem:[#allocation2 + $0x214] sm:$0xf] }
  0x4c   :  { %787 = vmatpush.bf16.msra.mxu2 %v1132_v16  ;;  %v1092_v9 = vor.u32 %v1271_v7, %v1089_v8  ;;  %v1270_v16 = vld [vmem:[#allocation2 + $0x204] sm:$0xf0] }
  0x4d   :  { %773 = vmatpush.bf16.msra.mxu1 %v1200_v1  ;;  %800 = vmatpush.bf16.msra.mxu3 %v1196_v17 }
  0x4f   :  { %761 = vmatpush.bf16.msra.mxu0 %v1128_v15  ;;  %v1079_v15 = vld [vmem:[#allocation2 + $0x200] sm:$0xf] }
  0x50   :  { %788 = vmatpush.bf16.msra.mxu2 %v1124_v23  ;;  %v1080_v18 = vor.u32 %v1270_v16, %v1079_v15  ;;  %v1296_v23 = vld [vmem:[#allocation2 + $0x2d4] sm:$0xf0] }
  0x51   :  { %774 = vmatpush.bf16.msra.mxu1 %v1192_v13 }
  0x53   :  { %762 = vmatpush.bf16.msra.mxu0 %v1120_v22  ;;  %v1183_v22 = vld [vmem:[#allocation2 + $0x2d0] sm:$0xf] }
  0x54   :  { %789 = vmatpush.bf16.msra.mxu2 %v1116_v49 }
  0x57   :  { %763 = vmatpush.bf16.msra.mxu0 %v1112_v47 }
  0x58   :  { %790 = vmatpush.bf16.msra.mxu2 %v1108_v55  ;;  %v1153_v55 = vld [vmem:[#allocation2 + $0x298] sm:$0xf0] }
  0x5b   :  { %764 = vmatpush.bf16.msra.mxu0 %v1104_v53  ;;  %v1287_v53 = vld [vmem:[#allocation2 + $0x294] sm:$0xf] }
  0x5c   :  { %791 = vmatpush.bf16.msra.mxu2 %v1100_v61  ;;  %v1156_v56 = vor.u32 %v1287_v53, %v1153_v55 }
  0x5f   :  { %765 = vmatpush.bf16.msra.mxu0 %v1096_v59  ;;  %v1286_v59 = vld [vmem:[#allocation2 + $0x284] sm:$0xf0] }
  0x60   :  { %792 = vmatpush.bf16.msra.mxu2 %v1092_v9  ;;  %v1144_v62 = vor.u32 %v1286_v59, %v1143_v58 }
  0x63   :  { %766 = vmatpush.bf16.msra.mxu0 %v1088_v6 }
  0x67   :  { %767 = vmatpush.bf16.msra.mxu0 %v1080_v18 }
  0xa7   :  { %v241_v25 = vpop.f32.mrf.mxu0 }
  0xa8   :  { %v242_v26 = vadd.f32 %v241_v25, %v68_v21  ;;  %v1084_v21 = vor.u32 %v1269_v19, %v1081_v20  ;;  %v1184_v25 = vor.u32 %v1296_v23, %v1183_v22 }
  0xa9   :  { %v254_v27 = vpop.f32.mrf.mxu1 }
  0xaa   :  { %v267_v28 = vpop.f32.mrf.mxu2  ;;  %v255_v29 = vadd.f32 %v254_v27, %v242_v26  ;;  %793 = vmatpush.bf16.msra.mxu2 %v1084_v21  ;;  %v1185_v26 = vld [vmem:[#allocation2 + $0x2d8] sm:$0xf0]  ;;  %775 = vmatpush.bf16.msra.mxu1 %v1184_v25 }
  0xab   :  { %v268_v30 = vadd.f32 %v267_v28, %v69_v24  ;;  %v280_v31 = vpop.f32.mrf.mxu3  ;;  %v1295_v24 = vld [vmem:[#allocation2 + $0x2d4] sm:$0xf]  ;;  %v1175_v28 = vld [vmem:[#allocation2 + $0x2c0] sm:$0xf] }
  0xac   :  { %v284_v32 = vmax.f32 %v255_v29, 0.0  ;;  %v1188_v27 = vor.u32 %v1295_v24, %v1185_v26  ;;  %v1294_v29 = vld [vmem:[#allocation2 + $0x2c4] sm:$0xf0] }
  0xad   :  { %v281_v33 = vadd.f32 %v280_v31, %v268_v30  ;;  %v1293_v30 = vld [vmem:[#allocation2 + $0x2c4] sm:$0xf]  ;;  %v1176_v31 = vor.u32 %v1294_v29, %v1175_v28 }
  0xae   :  { %v324_v34 = vpack.c.bf16 %v284_v32, %v284_v32  ;;  %801 = vmatpush.bf16.msra.mxu3 %v1188_v27  ;;  %v1177_v32 = vld [vmem:[#allocation2 + $0x2c8] sm:$0xf0]  ;;  %v1076_v28 = vld [vmem:[%s1387_s2 + $0x4] sm:$0x3] }
  0xaf   :  { %v285_v35 = vmul.f32 0.5, %v281_v33  ;;  %v243_v36 = vpop.f32.mrf.mxu0  ;;  %v1180_v33 = vor.u32 %v1293_v30, %v1177_v32  ;;  %776 = vmatpush.bf16.msra.mxu1 %v1176_v31  ;;  %v596_v29 = vperm.slane %v1076_v28, 0  ;;  %v597_v32 = vperm.slane %v1076_v28, 1 }
  0xb0   :  { %499 = vmatmul.bf16.vlgmr.msrb.gmra.mxu0 %v324_v34  ;;  %525 = vmatmul.bf16.vlgmr.msrb.gmra.mxu2 %v324_v34  ;;  %v1292_v36 = vld [vmem:[#allocation2 + $0x2b4] sm:$0xf0] }
  0xb1   :  { %1304 = vtanh.f32 %v285_v35  ;;  %v256_v37 = vpop.f32.mrf.mxu1  ;;  %v1167_v35 = vld [vmem:[#allocation2 + $0x2b0] sm:$0xf] }
  0xb2   :  { %v269_v38 = vpop.f32.mrf.mxu2  ;;  %802 = vmatpush.bf16.msra.mxu3 %v1180_v33  ;;  %v1291_v37 = vld [vmem:[#allocation2 + $0x2b4] sm:$0xf] }
  0xb3   :  { %v282_v39 = vpop.f32.mrf.mxu3  ;;  %v1168_v38 = vor.u32 %v1292_v36, %v1167_v35 }
  0xb4   :  { %v1169_v39 = vld [vmem:[#allocation2 + $0x2b8] sm:$0xf0] }
  0xb5   :  { %777 = vmatpush.bf16.msra.mxu1 %v1168_v38 }
  0xb7   :  { %v1305_v40 = vpop.eup %1304 }
  0xb8   :  { %v287_v41 = vmul.f32 0.5, %v1305_v40  ;;  %v1172_v40 = vor.u32 %v1291_v37, %v1169_v39 }
  0xba   :  { %v288_v42 = vadd.f32 0.5, %v287_v41  ;;  %v947_v41 = vld [vmem:[%s1387_s2 + $0x2] sm:$0x3]  ;;  %803 = vmatpush.bf16.msra.mxu3 %v1172_v40 }
  0xbb   :  { %v327_v49 = vperm.slane %v947_v41, 0  ;;  %v328_v61 = vperm.slane %v947_v41, 1 }
  0xbc   :  { %v325_v43 = vpack.c.bf16 %v288_v42, %v288_v42  ;;  %v1159_v42 = vld [vmem:[#allocation2 + $0x2a0] sm:$0xf] }
  0xbe   :  { %512 = vmatmul.bf16.vlgmr.msrb.gmra.mxu1 %v325_v43  ;;  %538 = vmatmul.bf16.vlgmr.msrb.gmra.mxu3 %v325_v43  ;;  %v1290_v43 = vld [vmem:[#allocation2 + $0x2a4] sm:$0xf0] }
  0xbf   :  { %v1160_v45 = vor.u32 %v1290_v43, %v1159_v42  ;;  %804 = vmatpush.bf16.msra.mxu3 %v1164_v48 }
  0xc1   :  { %778 = vmatpush.bf16.msra.mxu1 %v1160_v45 }
  0xc3   :  { %805 = vmatpush.bf16.msra.mxu3 %v1156_v56 }
  0xc5   :  { %779 = vmatpush.bf16.msra.mxu1 %v1152_v54 }
  0xc7   :  { %806 = vmatpush.bf16.msra.mxu3 %v1148_v2 }
  0xc9   :  { %780 = vmatpush.bf16.msra.mxu1 %v1144_v62 }
 0x12d   :  { %v500_v34 = vpop.f32.mrf.mxu0 }
 0x12e   :  { %v501_v57 = vadd.f32 %v500_v34, %v327_v49 }
 0x133   :  { %v526_v47 = vpop.f32.mrf.mxu2 }
 0x134   :  { %v527_v4 = vadd.f32 %v526_v47, %v328_v61 }
 0x135   :  { %v502_v50 = vpop.f32.mrf.mxu0 }
 0x13b   :  { %v513_v0 = vpop.f32.mrf.mxu1  ;;  %v528_v1 = vpop.f32.mrf.mxu2 }
 0x13c   :  { %v514_v3 = vadd.f32 %v513_v0, %v501_v57 }
 0x13e   :  { %1306 = vtanh.f32 %v514_v3 }
 0x141   :  { %v539_v5 = vpop.f32.mrf.mxu3 }
 0x142   :  { %v540_v6 = vadd.f32 %v539_v5, %v527_v4 }
 0x143   :  { %v515_v7 = vpop.f32.mrf.mxu1 }
 0x144   :  { %v1307_v8 = vpop.eup %1306  ;;  %v545_v9 = vmin.f32 %v540_v6, 20.0  ;;  %vm544_vm1 = vcmp.gt.f32.partialorder %v540_v6, 20.0 }
 0x145   :  { %v593_v10 = vpack.c.bf16 %v1307_v8, %v1307_v8 }
 0x146   :  { %v546_v11 = vmul.f32 1.442695, %v545_v9 }
 0x147   :  { %768 = vmatmul.bf16.vlgmr.msra.gmra.mxu0 %v593_v10  ;;  %794 = vmatmul.bf16.vlgmr.msra.gmra.mxu2 %v593_v10 }
 0x148   :  { %1308 = vpow2.f32 %v546_v11 }
 0x149   :  { %v541_v12 = vpop.f32.mrf.mxu3 }
 0x14e   :  { %v1309_v13 = vpop.eup %1308 }
 0x14f   :  { %v548_v14 = vadd.f32 1.0, %v1309_v13  ;;  %v551_v15 = vmul.f32 -0.5, %v1309_v13  ;;  %v554_v17 = vand.u32 2147483647, %v1309_v13 }
 0x151   :  { %1310 = vlog2.f32 %v548_v14  ;;  %v552_v16 = vadd.f32 1.0, %v551_v15  ;;  %vm555_vm0 = vcmp.lt.f32.partialorder %v554_v17, 0.0004427343 }
 0x153   :  { %v553_v20 = vmul.f32 %v1309_v13, %v552_v16 }
 0x157   :  { %v1311_v18 = vpop.eup %1310 }
 0x158   :  { %v550_v19 = vmul.f32 0.6931472, %v1311_v18 }
 0x15a   :  { %v556_v21 = vsel %vm555_vm0, %v553_v20, %v550_v19 }
 0x15b   :  { %v557_v22 = vsel %vm544_vm1, %v540_v6, %v556_v21 }
 0x15c   :  { %v594_v23 = vpack.c.bf16 %v557_v22, %v557_v22 }
 0x15e   :  { %781 = vmatmul.bf16.vlgmr.msra.gmra.mxu1 %v594_v23  ;;  %807 = vmatmul.bf16.vlgmr.msra.gmra.mxu3 %v594_v23 }
 0x1c4   :  { %v769_v24 = vpop.f32.mrf.mxu0 }
 0x1c5   :  { %v770_v30 = vadd.f32 %v769_v24, %v596_v29 }
 0x1ca   :  { %v795_v25 = vpop.f32.mrf.mxu2 }
 0x1cb   :  { %v796_v34 = vadd.f32 %v795_v25, %v597_v32 }
 0x1cc   :  { %v771_v26 = vpop.f32.mrf.mxu0 }
 0x1d2   :  { %v797_v27 = vpop.f32.mrf.mxu2 }
 0x1db   :  { %v782_v31 = vpop.f32.mrf.mxu1 }
 0x1dc   :  { %v783_v33 = vadd.f32 %v782_v31, %v770_v30 }
 0x1de   :  { %812 = vst [vmem:[%s1388_s3] sm:$0xff] %v783_v33 }
 0x1e1   :  { %v808_v35 = vpop.f32.mrf.mxu3 }
 0x1e2   :  { %v809_v36 = vadd.f32 %v808_v35, %v796_v34 }
 0x1e3   :  { %v784_v37 = vpop.f32.mrf.mxu1 }
 0x1e4   :  { %813 = vst [vmem:[%s1388_s3 + $0x8] sm:$0xff] %v809_v36 }
 0x1e9   :  { %v810_v38 = vpop.f32.mrf.mxu3 }
 0x1ea   :  { %818 = vsyncpa [#allocation3], 1 }

</bundles_post_ra>
